<compile_context>
chip_gen: v7x
topology: tpu7x:2x2x1
jax: 0.10.0
libtpu: 0.0.40
codegen_flags: <defaults>
</compile_context>

<pallas_src>
import functools

import jax
import jax.numpy as jnp
from jax.experimental import pallas as pl
from jax.experimental.pallas import tpu as pltpu


# --------------------------------------------------------------------------
# Small helpers
# --------------------------------------------------------------------------

def _vmem_capacity_bytes():
    try:
        return int(pltpu.get_tpu_info().vmem_capacity_bytes)
    except Exception:
        return 64 << 20                      # conservative: v7x per-core VMEM


def _buffered_spec(shape, index_map, buffers):
    """BlockSpec with deeper input pipelining when the API supports it."""
    try:
        return pl.BlockSpec(shape, index_map, pipeline_mode=pl.Buffered(buffers))
    except Exception:
        return pl.BlockSpec(shape, index_map)


def _candidate_tiles(n):
    """Spatial tile widths: multiples of 128 dividing n (descending), else n."""
    if n % 128 != 0:
        return [n]
    return [t for t in range(n, 0, -128) if n % t == 0]


def _pick_tile(n, per_col_bytes, fixed_bytes, budget, max_tile_cols):
    """Largest candidate tile whose steady-state VMEM estimate fits budget."""
    cands = _candidate_tiles(n)
    for tn in cands:
        if len(cands) > 1 and tn > max_tile_cols:
            continue
        if fixed_bytes + per_col_bytes * tn <= budget:
            return tn
    return None


# --------------------------------------------------------------------------
# Kernels
# --------------------------------------------------------------------------

def _fused_kernel(x_ref, q_ref, wv_t_ref, bv_ref, wz_ref, bz_ref,
                  ln_g_ref, ln_b_ref, o_ref, s_acc, *, tn, lanes):
    """Single-pass fused kernel.

    x_ref : (1, c, tn) streamed tile     q_ref : (1, 1, tn) softmax weights
    wv_t  : (c, c/2) == Wv^T   bv : (1, c/2)
    wz    : (c, c/2) == Wz     bz : (c, 1)     ln_g, ln_b : (c, 1)
    o_ref : (1, c, n) per-batch output slab, VMEM-resident across t
    s_acc : (c, lanes) f32 per-lane partial sums
    """
    t = pl.program_id(1)
    nt = pl.num_programs(1)

    @pl.when(t == 0)
    def _init():
        s_acc[...] = jnp.zeros_like(s_acc)

    x = x_ref[0]                                       # (c, tn) input dtype
    xq = x.astype(jnp.float32) * q_ref[0]              # (c, tn) f32

    if lanes > 1:
        # Per-lane partials: pure VALU adds, no per-tile cross-lane reduce.
        for k in range(tn // lanes):
            s_acc[...] += xq[:, k * lanes:(k + 1) * lanes]
    else:
        s_acc[...] += jnp.sum(xq, axis=1, keepdims=True)

    # Cache this tile inside the resident per-batch output slab.
    if tn == o_ref.shape[-1]:
        o_ref[0] = x
    else:
        start = pl.multiple_of(t * tn, 128)            # tile-aligned lane offset
        o_ref[0, :, pl.ds(start, tn)] = x

    @pl.when(t == nt - 1)
    def _head_and_scale():
        # Collapse lane partials once.
        s = jnp.sum(s_acc[...], axis=1, keepdims=True)                        # (c,1)
        # ch_wv (bias folded: sum(q) == 1):  z[d] = sum_k Wv[d,k]*s[k] + bv[d]
        z = jnp.sum(wv_t_ref[...] * s, axis=0, keepdims=True) + bv_ref[...]   # (1,c/2)
        # ch_wz:  zc[j] = sum_d Wz[j,d]*z[d] + bz[j]
        zc = jnp.sum(wz_ref[...] * z, axis=1, keepdims=True) + bz_ref[...]    # (c,1)
        # LayerNorm over channels (sublanes) + sigmoid.
        mu = jnp.mean(zc, axis=0, keepdims=True)
        var = jnp.mean((zc - mu) ** 2, axis=0, keepdims=True)
        ln = (zc - mu) * jax.lax.rsqrt(var + 1e-5) * ln_g_ref[...] + ln_b_ref[...]
        wgt = jax.nn.sigmoid(ln)                                              # (c,1)
        # Scale the cached slab in place (native-dtype multiply).
        o_ref[0] = o_ref[0] * wgt.astype(o_ref.dtype)


def _reduce_kernel(x_ref, q_ref, s_ref, s_acc, *, tn, lanes):
    """Two-pass fallback, phase 1: s = sum_n q_n * x_n (head runs in JAX)."""
    t = pl.program_id(1)
    nt = pl.num_programs(1)

    @pl.when(t == 0)
    def _init():
        s_acc[...] = jnp.zeros_like(s_acc)

    xq = x_ref[0].astype(jnp.float32) * q_ref[0]
    if lanes > 1:
        for k in range(tn // lanes):
            s_acc[...] += xq[:, k * lanes:(k + 1) * lanes]
    else:
        s_acc[...] += jnp.sum(xq, axis=1, keepdims=True)

    @pl.when(t == nt - 1)
    def _fin():
        s_ref[0] = jnp.sum(s_acc[...], axis=1, keepdims=True)


def _scale_kernel(x_ref, w_ref, o_ref):
    """Two-pass fallback, phase 2: out = channel_weight * x."""
    o_ref[0] = x_ref[0] * w_ref[0].astype(o_ref.dtype)


# --------------------------------------------------------------------------
# pallas_call wrappers
# --------------------------------------------------------------------------

def _fused_forward(x_bcn, q_b1n, params, tn, vmem_limit):
    b, c, n = x_bcn.shape
    ch = c // 2
    wv_t, bv, wz, bz, ln_g, ln_b = params
    nt = n // tn
    lanes = 128 if (tn % 128 == 0 and tn // 128 <= 32) else 1

    def const(shape):
        return pl.BlockSpec(shape, lambda i, t: (0,) * len(shape))

    return pl.pallas_call(
        functools.partial(_fused_kernel, tn=tn, lanes=lanes),
        out_shape=jax.ShapeDtypeStruct((b, c, n), x_bcn.dtype),
        grid_spec=pltpu.PrefetchScalarGridSpec(
            num_scalar_prefetch=0,
            grid=(b, nt),
            in_specs=[
                _buffered_spec((1, c, tn), lambda i, t: (i, 0, t), 3),   # x stream
                pl.BlockSpec((1, 1, tn), lambda i, t: (i, 0, t)),        # softmax(q)
                const((c, ch)),                                          # Wv^T
                const((1, ch)),                                          # bv
                const((c, ch)),                                          # Wz
                const((c, 1)),                                           # bz
                const((c, 1)),                                           # ln gamma
                const((c, 1)),                                           # ln beta
            ],
            # Per-batch output slab: block index invariant over t => resident.
            out_specs=pl.BlockSpec((1, c, n), lambda i, t: (i, 0, 0)),
            scratch_shapes=[pltpu.VMEM((c, lanes), jnp.float32)],
        ),
        compiler_params=pltpu.CompilerParams(
            dimension_semantics=("parallel", "arbitrary"),
            vmem_limit_bytes=vmem_limit),
    )(x_bcn, q_b1n, wv_t, bv, wz, bz, ln_g, ln_b)


def _reduce_sum(x_bcn, q_b1n, tn, vmem_limit):
    b, c, n = x_bcn.shape
    nt = n // tn
    lanes = 128 if (tn % 128 == 0 and tn // 128 <= 32) else 1
    return pl.pallas_call(
        functools.partial(_reduce_kernel, tn=tn, lanes=lanes),
        out_shape=jax.ShapeDtypeStruct((b, c, 1), jnp.float32),
        grid_spec=pltpu.PrefetchScalarGridSpec(
            num_scalar_prefetch=0,
            grid=(b, nt),
            in_specs=[
                pl.BlockSpec((1, c, tn), lambda i, t: (i, 0, t)),        # x
                pl.BlockSpec((1, 1, tn), lambda i, t: (i, 0, t)),        # softmax(q)
            ],
            out_specs=pl.BlockSpec((1, c, 1), lambda i, t: (i, 0, 0)),
            scratch_shapes=[pltpu.VMEM((c, lanes), jnp.float32)],
        ),
        compiler_params=pltpu.CompilerParams(
            dimension_semantics=("parallel", "arbitrary"),
            vmem_limit_bytes=vmem_limit),
    )(x_bcn, q_b1n)


def _scale(x_bcn, w_bc1, tn, vmem_limit):
    b, c, n = x_bcn.shape
    nt = n // tn
    return pl.pallas_call(
        _scale_kernel,
        out_shape=jax.ShapeDtypeStruct((b, c, n), x_bcn.dtype),
        grid_spec=pltpu.PrefetchScalarGridSpec(
            num_scalar_prefetch=0,
            grid=(b, nt),
            in_specs=[
                pl.BlockSpec((1, c, tn), lambda i, t: (i, 0, t)),        # x
                pl.BlockSpec((1, c, 1), lambda i, t: (i, 0, 0)),         # weight
            ],
            out_specs=pl.BlockSpec((1, c, tn), lambda i, t: (i, 0, t)),
        ),
        compiler_params=pltpu.CompilerParams(
            dimension_semantics=("parallel", "parallel"),
            vmem_limit_bytes=vmem_limit),
    )(x_bcn, w_bc1)


def _head_jax(s_bc1, params):
    """Tiny per-batch head (Wv, Wz, LayerNorm, sigmoid) in plain JAX."""
    wv_t, bv, wz, bz, ln_g, ln_b = params
    s = s_bc1[..., 0]                                   # (b, c) f32
    z = s @ wv_t + bv                                   # (b, c/2)
    zc = z @ wz.T + bz[:, 0]                            # (b, c)
    mu = jnp.mean(zc, axis=-1, keepdims=True)
    var = jnp.mean((zc - mu) ** 2, axis=-1, keepdims=True)
    ln = (zc - mu) * jax.lax.rsqrt(var + 1e-5) * ln_g[:, 0] + ln_b[:, 0]
    return jax.nn.sigmoid(ln)[:, :, None].astype(jnp.float32)   # (b, c, 1)


def attention_forward(x_nchw, y_n1hw, params, *, force_two_pass=False,
                      tile_override=None):
    """PyTorch-equivalent forward. x: (b,c,h,w) NCHW, y: (b,1,h,w)."""
    b, c, h, w = x_nchw.shape
    n = h * w
    ch = c // 2
    x_bcn = x_nchw.reshape(b, c, n)                     # free reshape, no transpose
    # Spatial softmax of y (b*n scalars, negligible) in plain JAX, f32.
    q_b1n = jax.nn.softmax(y_n1hw.reshape(b, 1, n).astype(jnp.float32), axis=-1)

    isize = x_bcn.dtype.itemsize
    cap = _vmem_capacity_bytes()
    vmem_limit = max(int(cap * 7 // 8), 32 << 20)
    budget = max(int(cap * 3 // 5), 24 << 20)
    param_bytes = 4 * (2 * c * ch + ch + 3 * c)         # f32 head params
    max_tile_cols = max(128, ((4 << 20) // max(c * isize, 1)) // 128 * 128)

    if not force_two_pass:
        # Fused single pass: 2 output slabs + streamed x tiles + temps + params.
        fixed = 2 * c * n * isize + 2 * param_bytes + c * 128 * 4
        per_col = 3 * c * isize + 2 * c * 4 + 3 * 4
        if tile_override is not None and n % tile_override == 0:
            tn = tile_override
        else:
            tn = _pick_tile(n, per_col, fixed, budget, max_tile_cols)
        if tn is not None:
            try:
                out = _fused_forward(x_bcn, q_b1n, params, tn, vmem_limit)
                return out.reshape(b, c, h, w)
            except Exception:
                pass       # fall back to the proven two-pass path below

    # ---- Two-pass fallback (slab too big for VMEM): reduce -> head -> scale.
    per_col1 = 3 * c * isize + 2 * c * 4 + 3 * 4
    tn1 = _pick_tile(n, per_col1, c * 128 * 4, budget, max_tile_cols)
    tn1 = tn1 if tn1 is not None else _candidate_tiles(n)[-1]
    s = _reduce_sum(x_bcn, q_b1n, tn1, vmem_limit)                # (b, c, 1) f32
    weight = _head_jax(s, params)                                 # (b, c, 1) f32

    per_col2 = 5 * c * isize + 2 * c * 4
    tn2 = _pick_tile(n, per_col2, 2 * c * 4, budget, max_tile_cols)
    tn2 = tn2 if tn2 is not None else _candidate_tiles(n)[-1]
    out = _scale(x_bcn, weight, tn2, vmem_limit)                  # (b, c, n)
    return out.reshape(b, c, h, w)


# --------------------------------------------------------------------------
# Pure-JAX reference (mirrors the PyTorch forward exactly)
# --------------------------------------------------------------------------

def attention_reference(x_nchw, y_n1hw, params):
    wv_t, bv, wz, bz, ln_g, ln_b = params
    b, c, h, w = x_nchw.shape
    n = h * w
    chan_wv = jnp.einsum('kd,bkhw->bdhw', wv_t, x_nchw) + bv.reshape(1, -1, 1, 1)
    chan_wv = chan_wv.reshape(b, c // 2, n)                       # (b, c/2, n)
    q = jax.nn.softmax(y_n1hw.reshape(b, n, 1), axis=1)           # (b, n, 1)
    z = jnp.matmul(chan_wv, q)                                    # (b, c/2, 1)
    zc = jnp.einsum('jd,bdi->bji', wz, z) + bz.reshape(1, -1, 1)  # (b, c, 1)
    zc_t = jnp.transpose(zc, (0, 2, 1))                           # (b, 1, c)
    mu = jnp.mean(zc_t, axis=-1, keepdims=True)
    var = jnp.mean((zc_t - mu) ** 2, axis=-1, keepdims=True)
    ln = (zc_t - mu) / jnp.sqrt(var + 1e-5) * ln_g.reshape(1, 1, -1) \
         + ln_b.reshape(1, 1, -1)
    weight = jax.nn.sigmoid(ln)                                   # (b, 1, c)
    weight = jnp.transpose(weight, (0, 2, 1)).reshape(b, c, 1, 1)
    return weight * x_nchw


def make_params(key, channel):
    c_half = channel // 2
    k1, k2, k3, k4 = jax.random.split(key, 4)
    # Conv2d(channel, channel//2, 1): weight (c/2, c) -> stored transposed (c, c/2)
    wv_t = jax.random.normal(k1, (channel, c_half), jnp.float32) * 0.1
    bv = jax.random.normal(k2, (1, c_half), jnp.float32) * 0.1
    # Conv2d(channel//2, channel, 1): weight stored natural (c, c/2)
    wz = jax.random.normal(k3, (channel, c_half), jnp.float32) * 0.1
    bz = jax.random.normal(k4, (channel, 1), jnp.float32) * 0.1
    # LayerNorm(channel): default init gamma=1, beta=0 (stored as columns)
    ln_g = jnp.ones((channel, 1), jnp.float32)
    ln_b = jnp.zeros((channel, 1), jnp.float32)
    return (wv_t, bv, wz, bz, ln_g, ln_b)


if __name__ == "__main__":
    key = jax.random.PRNGKey(0)
    kx, ky, kp = jax.random.split(key, 3)

    b, c, h, w = 2, 4, 16, 16
    x = jax.random.normal(kx, (b, c, h, w), jnp.float32)
    y = jax.random.normal(ky, (b, 1, h, w), jnp.float32)
    params = make_params(kp, c)

    ref = attention_reference(x, y, params)

    # 1) Fused single-pass path (largest fitting tile).
    out = jax.block_until_ready(attention_forward(x, y, params))
    assert out.shape == (b, c, h, w)
    assert jnp.allclose(out, ref, atol=1e-4, rtol=1e-4), \
        f"fused max err {jnp.max(jnp.abs(out - ref))}"

    # 2) Fused path with a forced smaller tile (exercises the multi-tile sweep
    #    and the tile-aligned cache stores into the resident output slab).
    out_tiled = jax.block_until_ready(
        attention_forward(x, y, params, tile_override=128))
    assert jnp.allclose(out_tiled, ref, atol=1e-4, rtol=1e-4), \
        f"tiled max err {jnp.max(jnp.abs(out_tiled - ref))}"

    # 3) Two-pass fallback path (used when the per-batch slab exceeds VMEM).
    out_2p = jax.block_until_ready(
        attention_forward(x, y, params, force_two_pass=True))
    assert jnp.allclose(out_2p, ref, atol=1e-4, rtol=1e-4), \
        f"two-pass max err {jnp.max(jnp.abs(out_2p - ref))}"

    print("KERNEL_OK")
</pallas_src>

<mosaic_0001>
module attributes {stable_mosaic.version = 11 : i64} {
  func.func @_reduce_kernel(%arg0: i32, %arg1: i32, %arg2: memref<1x4x256xf32, #tpu.memory_space<vmem>>, %arg3: memref<1x1x256xf32, #tpu.memory_space<vmem>>, %arg4: memref<1x4x1xf32, #tpu.memory_space<vmem>>, %arg5: memref<4x128xf32, #tpu.memory_space<vmem>>) attributes {dimension_semantics = [#tpu.dimension_semantics<parallel>, #tpu.dimension_semantics<arbitrary>], iteration_bounds = array<i64: 2, 1>, scalar_prefetch = 0 : i64, scratch_operands = 1 : i64, tpu.core_type = #tpu.core_type<tc>, window_params = [{transform_indices = @transform_0, window_bounds = array<i64: 1, 4, 256>}, {transform_indices = @transform_1, window_bounds = array<i64: 1, 1, 256>}, {transform_indices = @transform_2, window_bounds = array<i64: 1, 4, 1>}]} {
    %c0_i32 = arith.constant 0 : i32
    %0 = arith.cmpi eq, %arg1, %c0_i32 : i32
    %1 = arith.extui %0 : i1 to i32
    %c0_i32_0 = arith.constant 0 : i32
    %2 = arith.cmpi ne, %1, %c0_i32_0 : i32
    scf.if %2 {
      %cst = arith.constant 0.000000e+00 : f32
      %20 = vector.broadcast %cst : f32 to vector<4x128xf32>
      %c0_16 = arith.constant 0 : index
      %c0_17 = arith.constant 0 : index
      %21 = vector.load %arg5[%c0_16, %c0_17] : memref<4x128xf32, #tpu.memory_space<vmem>>, vector<4x128xf32>
      tpu.vector_store %arg5[%c0_16, %c0_17], %20 {strides = array<i32>} : memref<4x128xf32, #tpu.memory_space<vmem>>, vector<4x128xf32>,
    } else {
    }
    %c0 = arith.constant 0 : index
    %c0_1 = arith.constant 0 : index
    %c0_2 = arith.constant 0 : index
    %3 = vector.load %arg2[%c0, %c0_1, %c0_2] : memref<1x4x256xf32, #tpu.memory_space<vmem>>, vector<1x4x256xf32>
    %4 = vector.shape_cast %3 : vector<1x4x256xf32> to vector<4x256xf32>
    %c0_3 = arith.constant 0 : index
    %c0_4 = arith.constant 0 : index
    %c0_5 = arith.constant 0 : index
    %5 = vector.load %arg3[%c0_3, %c0_4, %c0_5] : memref<1x1x256xf32, #tpu.memory_space<vmem>>, vector<1x1x256xf32>
    %6 = vector.shape_cast %5 : vector<1x1x256xf32> to vector<1x256xf32>
    %7 = vector.broadcast %6 : vector<1x256xf32> to vector<4x256xf32>
    %8 = arith.mulf %4, %7 : vector<4x256xf32>
    %c0_6 = arith.constant 0 : index
    %c0_7 = arith.constant 0 : index
    %9 = vector.load %arg5[%c0_6, %c0_7] : memref<4x128xf32, #tpu.memory_space<vmem>>, vector<4x128xf32>
    %10 = vector.extract_strided_slice %8 {offsets = [0, 0], sizes = [4, 128], strides = [1, 1]} : vector<4x256xf32> to vector<4x128xf32>
    %11 = arith.addf %9, %10 : vector<4x128xf32>
    %c0_8 = arith.constant 0 : index
    %c0_9 = arith.constant 0 : index
    %12 = vector.load %arg5[%c0_8, %c0_9] : memref<4x128xf32, #tpu.memory_space<vmem>>, vector<4x128xf32>
    tpu.vector_store %arg5[%c0_8, %c0_9], %11 {strides = array<i32>} : memref<4x128xf32, #tpu.memory_space<vmem>>, vector<4x128xf32>,
    %c0_10 = arith.constant 0 : index
    %c0_11 = arith.constant 0 : index
    %13 = vector.load %arg5[%c0_10, %c0_11] : memref<4x128xf32, #tpu.memory_space<vmem>>, vector<4x128xf32>
    %14 = vector.extract_strided_slice %8 {offsets = [0, 128], sizes = [4, 128], strides = [1, 1]} : vector<4x256xf32> to vector<4x128xf32>
    %15 = arith.addf %13, %14 : vector<4x128xf32>
    %c0_12 = arith.constant 0 : index
    %c0_13 = arith.constant 0 : index
    %16 = vector.load %arg5[%c0_12, %c0_13] : memref<4x128xf32, #tpu.memory_space<vmem>>, vector<4x128xf32>
    tpu.vector_store %arg5[%c0_12, %c0_13], %15 {strides = array<i32>} : memref<4x128xf32, #tpu.memory_space<vmem>>, vector<4x128xf32>,
    %c0_i32_14 = arith.constant 0 : i32
    %17 = arith.cmpi eq, %arg1, %c0_i32_14 : i32
    %18 = arith.extui %17 : i1 to i32
    %c0_i32_15 = arith.constant 0 : i32
    %19 = arith.cmpi ne, %18, %c0_i32_15 : i32
    scf.if %19 {
      %c0_16 = arith.constant 0 : index
      %c0_17 = arith.constant 0 : index
      %20 = vector.load %arg5[%c0_16, %c0_17] : memref<4x128xf32, #tpu.memory_space<vmem>>, vector<4x128xf32>
      %cst = arith.constant dense<0.000000e+00> : vector<4xf32>
      %21 = vector.multi_reduction <add>, %20, %cst [1] : vector<4x128xf32> to vector<4xf32>
      %22 = vector.shape_cast %21 : vector<4xf32> to vector<4x1xf32>
      %c0_18 = arith.constant 0 : index
      %c0_19 = arith.constant 0 : index
      %c0_20 = arith.constant 0 : index
      %23 = vector.load %arg4[%c0_18, %c0_19, %c0_20] : memref<1x4x1xf32, #tpu.memory_space<vmem>>, vector<1x4x1xf32>
      %24 = vector.shape_cast %23 : vector<1x4x1xf32> to vector<4x1xf32>
      %25 = vector.shape_cast %22 : vector<4x1xf32> to vector<1x4x1xf32>
      tpu.vector_store %arg4[%c0_18, %c0_19, %c0_20], %25 {strides = array<i32>} : memref<1x4x1xf32, #tpu.memory_space<vmem>>, vector<1x4x1xf32>,
    } else {
    }
    return
  }
  func.func @transform_0(%arg0: i32, %arg1: i32) -> (i32, i32, i32) {
    %c0_i32 = arith.constant 0 : i32
    %c0_i32_0 = arith.constant 0 : i32
    return %arg0, %c0_i32, %arg1 : i32, i32, i32
  }
  func.func @transform_1(%arg0: i32, %arg1: i32) -> (i32, i32, i32) {
    %c0_i32 = arith.constant 0 : i32
    %c0_i32_0 = arith.constant 0 : i32
    return %arg0, %c0_i32, %arg1 : i32, i32, i32
  }
  func.func @transform_2(%arg0: i32, %arg1: i32) -> (i32, i32, i32) {
    %c0_i32 = arith.constant 0 : i32
    %c0_i32_0 = arith.constant 0 : i32
    %c0_i32_1 = arith.constant 0 : i32
    return %arg0, %c0_i32, %c0_i32_0 : i32, i32, i32
  }
}

</mosaic_0001>

<bundles_post_ra>
// kernel: tpu_custom_call.1
= control target key start
LH: loop header
LB: loop body
LE: loop exit
PB: predicated region body
PF: predicated region fallthrough
CT: control target
= control target key end

     0   :  { %7 = vsyncpa [#allocation4], 0  ;;  %s739_s0 = inlined_call_operand.hbm [shape: f32[2,4,256], index: 0, kind: input, shape index: {}]   ;;  %s740_s1 = inlined_call_operand.hbm [shape: f32[2,1,256], index: 1, kind: input, shape index: {}]   ;;  %s741_s2 = inlined_call_operand.vmem [shape: f32[2,4,1], index: 2, kind: output, shape index: {}]  }
   0x1   :  { %9 = vsyncpa [#allocation4 + $0x1], 0 }
   0x2   :  { %10 = vsyncpa [#allocation6], 0 }
   0x3   :  { %12 = vsyncpa [#allocation6 + $0x1], 0  ;;  %s573_s9 = smov 0   ;;  %s575_s10 = smov 0  }
   0x4   :  { %s577_s11 = smov 0   ;;  %s579_s12 = smov 0  }
   0x5   :  { %s581_s13 = smov 0   ;;  %s583_s14 = smov 0  }
   0x6 LB: > { %s360_s15 = sadd.s32 4294967295, %s553_s14   ;;  %s30_s16 = sadd.s32 1, %s549_s13  ;;  %s553_s14 = sphi %s583_s14, %s18_s14   ;;  %s549_s13 = sphi %s581_s13, %s755_s13   ;;  %s545_s12 = sphi %s579_s12, %s754_s12   ;;  %s541_s11 = sphi %s577_s11, %s753_s11   ;;  %s537_s10 = sphi %s575_s10, %s752_s10   ;;  %s533_s9 = sphi %s573_s9, %s751_s9  }
   0x7   : > { %p32_p0 = scmp.ge.s32.totalorder %s30_s16, 2  ;;  %s39_s17 = sadd.s32 1, %s541_s11 }
   0x8   : > { %p46_p1 = scmp.ne.s32.totalorder %s541_s11, %s537_s10  ;;  %p47_p2 = scmp.eq.s32.totalorder %s553_s14, 0 }
   0x9   : > { %s757_s16 = smov (%p32_p0, %s30_s16), 0  ;;  %p52_p4 = scmp.ne.s32.totalorder %s537_s10, %s533_s9 }
   0xa   : > { %p609_p3 = por %p47_p2, %p46_p1  ;;  %s34_s19 = ssub.s32 %s549_s13, %s757_s16 }
   0xb   : > { %p53_p5 = scmp.eq.s32.totalorder %s360_s15, 0  ;;  %p37_p6 = scmp.eq.s32.totalorder %s34_s19, 0 }
   0xc   : > { %p389_p8 = scmp.lt.s32.totalorder %s553_s14, 2  ;;  %s625_s22 = sand.u32 1, %s541_s11  }
   0xd   : > { %p616_p7 = por %p53_p5, %p52_p4  ;;  %s376_s23 = sshll.u32 %s549_s13, 7 }
   0xe   : > { %s622_s21 = scalar_select %p37_p6, %s541_s11, %s39_s17  }
   0xf   : > { %s744_s20 = scalar_select %p616_p7, 1, 0 }
  0x10   : > { %s364_s24 = sshll.u32 %s625_s22, 3  ;;  %s632_s27 = scalar_lea.hbm %s739_s0, %s376_s23 }
  0x11   : > { %s134_s28 = scalar_lea.vmem [#allocation3], %s364_s24  ;;  %p636_p9 = pnand %p389_p8, %p609_p3 }
  0x12   : > { %s144_s29 = sshll.u32 %s134_s28, 4  ;;  %s131_s3 = scalar_lea.sflag [#allocation4], %s625_s22  ;;  %s640_s29 = int_to_ptr.vmem [resolvable:$true] %s144_s29 }
  0x13   : > { %s439_s4 = scalar_lea.hbm %s632_s27, 128  ;;  %p441_p13 = pneg %p636_p9 }
  0x14   : > { %p440_p12 = scmp.ne.s32.totalorder %s632_s27, %s439_s4  ;;  %s444_s7 = scalar_lea.hbm %s739_s0, 256 }
  0x15   : > { %p445_p2 = scmp.lt.u32.totalorder %s632_s27, %s739_s0  ;;  %p446_p3 = scmp.lt.u32.totalorder %s444_s7, %s439_s4 }
  0x16   : > { %p442_p0 = pnand %p441_p13, %p440_p12  ;;  %p448_p5 = scmp.lt.u32.totalorder %s439_s4, %s632_s27 }
  0x17   : > { %p447_p4 = por %p446_p3, %p445_p2 }
  0x18   : > { %p443_p1 = pneg %p442_p0 }
  0x19   : > { %p449_p6 = por %p448_p5, %p447_p4 }
  0x1b   : > { %p450_p8 = pnand %p449_p6, %p443_p1 }
  0x1d   : > { %453 = shalt.err (!%p450_p8)
}
  0x1e   : > { %s454_s15 = scalar_lea.vmem %s640_s29, 128  ;;  %s555_s17 = smov [#allocation3]  }
  0x1f   : > { %p455_p12 = scmp.ne.s32.totalorder %s640_s29, %s454_s15  ;;  %s459_s18 = sshll.u32 %s555_s17, 4  ;;  %s460_s18 = int_to_ptr.vmem [resolvable:$false] %s459_s18 }
  0x20   : > { %s461_s19 = scalar_lea.vmem %s460_s18, 256  ;;  %p462_p11 = scmp.lt.s32.totalorder %s640_s29, %s460_s18 }
  0x21   : > { %p457_p0 = pnand %p455_p12, %p441_p13  ;;  %p463_p2 = scmp.lt.s32.totalorder %s461_s19, %s454_s15 }
  0x23   : > { %p458_p10 = pneg %p457_p0  ;;  %p464_p3 = por %p463_p2, %p462_p11 }
  0x25   : > { %p465_p4 = pnand %p464_p3, %p458_p10 }
  0x27   : > { %468 = shalt.err (!%p465_p4)
}
  0x28   : > { %385 = dma.hbm_to_vmem [thread:$0]  (!%p636_p9), %s632_s27, 128, %s640_s29, %s131_s3  }
  0x29   : > { %p746_p1 = scmp.lt.s32.totalorder %s553_s14, 3  ;;  %p747_p5 = scmp.ge.s32.totalorder %s553_s14, 1 }
  0x2a   : > { %s367_s24 = sshll.u32 %s625_s22, 1  ;;  %s377_s25 = sshll.u32 %s549_s13, 5 }
  0x2b   : > { %p674_p6 = pnand %p747_p5, %p746_p1  ;;  %s683_s4 = scalar_lea.hbm %s740_s1, %s377_s25 }
  0x2c   : > { %s155_s5 = scalar_lea.vmem [#allocation5], %s367_s24  ;;  %s152_s27 = scalar_lea.sflag [#allocation6], %s625_s22 }
  0x2d   : > { %s748_s23 = scalar_select %p674_p6, 1, 0 }
  0x2e   : > { %s165_s6 = sshll.u32 %s155_s5, 4  ;;  %s469_s29 = scalar_lea.hbm %s683_s4, 32  ;;  %s166_s6 = int_to_ptr.vmem [resolvable:$true] %s165_s6 }
  0x2f   : > { %p470_p10 = scmp.ne.s32.totalorder %s683_s4, %s469_s29  ;;  %s474_s8 = scalar_lea.hbm %s740_s1, 64 }
  0x30   : > { %p475_p12 = scmp.lt.u32.totalorder %s683_s4, %s740_s1  ;;  %p476_p0 = scmp.lt.u32.totalorder %s474_s8, %s469_s29 }
  0x31   : > { %p472_p11 = pnand %p470_p10, %p441_p13  ;;  %p478_p3 = scmp.lt.u32.totalorder %s469_s29, %s683_s4 }
  0x32   : > { %p477_p2 = por %p476_p0, %p475_p12 }
  0x33   : > { %p473_p8 = pneg %p472_p11 }
  0x34   : > { %p479_p4 = por %p478_p3, %p477_p2 }
  0x36   : > { %p480_p1 = pnand %p479_p4, %p473_p8 }
  0x38   : > { %483 = shalt.err (!%p480_p1)
}
  0x39   : > { %s484_s22 = scalar_lea.vmem %s166_s6, 32  ;;  %s556_s17 = smov [#allocation5]  }
  0x3a   : > { %p485_p5 = scmp.ne.s32.totalorder %s166_s6, %s484_s22  ;;  %s489_s18 = sshll.u32 %s556_s17, 4  ;;  %s490_s18 = int_to_ptr.vmem [resolvable:$false] %s489_s18 }
  0x3b   : > { %s491_s19 = scalar_lea.vmem %s490_s18, 64  ;;  %p492_p7 = scmp.lt.s32.totalorder %s166_s6, %s490_s18 }
  0x3c   : > { %p487_p10 = pnand %p485_p5, %p441_p13  ;;  %p493_p6 = scmp.lt.s32.totalorder %s491_s19, %s484_s22 }
  0x3e   : > { %p488_p11 = pneg %p487_p10  ;;  %p494_p0 = por %p493_p6, %p492_p7 }
  0x40   : > { %p495_p12 = pnand %p494_p0, %p488_p11 }
  0x42   : > { %498 = shalt.err (!%p495_p12)
}
  0x43   : > { %388 = dma.hbm_to_vmem [thread:$0]  (!%p636_p9), %s683_s4, 32, %s166_s6, %s152_s27  }
  0x44   : > { %p749_p8 = scmp.ne.s32.totalorder %s748_s23, 0 }
  0x45   : > { %s176_s24 = sand.u32 (!%p749_p8), 1, %s537_s10   ;;  %p750_p13 = scmp.ne.s32.totalorder (!%p749_p8), %s744_s20, 0 }
  0x46   : > { %174 = sbr.rel (%p749_p8) target bundleno = 257 (0x101), region = 28  ;;  %s371_s25 = sshll.u32 (!%p749_p8), %s176_s24, 3 }
  0x47   : > { %s177_s26 = scalar_lea.sflag (!%p749_p8), [#allocation4], %s176_s24  ;;  %s180_s28 = scalar_lea.vmem (!%p749_p8), [#allocation3], %s371_s25 }
  0x4d   : > { %524 = dma.done.wait (%p750_p13), %s177_s26, 128  }
  0x4e   : > { %526 = vsyncadd (%p750_p13), %s177_s26, 4294967168  ;;  %s372_s5 = sshll.u32 %s176_s24, 1  ;;  %s186_s29 = scalar_lea.sflag [#allocation6], %s176_s24 }
  0x4f   : > { %s189_s30 = scalar_lea.vmem [#allocation5], %s372_s5 }
  0x50   : > { %528 = dma.done.wait (%p750_p13), %s186_s29, 32  }
  0x51   : > { %530 = vsyncadd (%p750_p13), %s186_s29, 4294967264  ;;  %v228_v0 = vlaneseq  ;;  %v557_v1 = vmov 0.0   ;;  %v226_v5 = vld [vmem:[%s189_s30] sm:$0x3]  ;;  %v225_v8 = vld [vmem:[%s180_s28] sm:$0xff]  ;;  %vm252_vm0 = vcmask 1043456  }
  0x52   : > { %224 = vst [vmem:[#allocation2] sm:$0xf] %v557_v1  ;;  %p216_p7 = scmp.lt.s32.totalorder %s545_s12, 1  ;;  %vm256_vm1 = vcmask 3072  }
  0x53   : > { %v229_v2 = vshrl.u32 %v228_v0, 7 }
  0x54   : > { %s759_s12 = smov (!%p216_p7, %s545_s12), 1 }
  0x55   : > { %v230_v3 = vsub.s32 0, %v229_v2  ;;  %v234_v4 = vsub.s32 1, %v229_v2  ;;  %s373_s20 = sshll.u32 %s759_s12, 2 }
  0x56   : > { %s219_s6 = scalar_lea.vmem %s741_s2, %s373_s20 }
  0x57   : > { %v231_v6 = vrot.slane %v226_v5, %v230_v3  ;;  %v235_v7 = vrot.slane %v226_v5, %v234_v4 }
  0x59   : > { %v236_v9 = vcombine.low %v231_v6, %v235_v7  ;;  %v239_v10 = vld [vmem:[#allocation2] sm:$0xf] }
  0x5b   : > { %v238_v11 = vmul.f32 %v236_v9, %v225_v8 }
  0x5d   : > { %v240_v12 = vadd.f32 %v239_v10, %v238_v11  ;;  %v244_v13 = vcombine.high %v238_v11, %v238_v11 }
  0x5f   : > { %241 = vst [vmem:[#allocation2] sm:$0xf] %v240_v12 }
  0x66   : > { %v242_v14 = vld [vmem:[#allocation2] sm:$0xf] }
  0x67   : > { %v246_v15 = vadd.f32 %v244_v13, %v242_v14 }
  0x69   : > { %247 = vst [vmem:[#allocation2] sm:$0xf] %v246_v15 }
  0x70   : > { %v251_v16 = vld [vmem:[#allocation2] sm:$0xf] }
  0x71   : > { %v253_v17 = vsel %vm252_vm0, %v251_v16, 0.0 }
  0x72   : > { %254 = vadd.xlane.f32.xlu0 %v253_v17 }
  0xff   : > { %v255_v18 = vpop.xlane.xlu0 %254 }
 0x100   : > { %257 = vst.msk [vmem:[%s219_s6] sm:$0xf] %vm256_vm1, %v255_v18 }
 0x101 PF: > { %s18_s14 = sadd.s32 1, %s553_s14   ;;  %s751_s9 = smov %s537_s10 }
 0x102   : > { %p15_p9 = scmp.ge.s32.totalorder %s18_s14, 4   ;;  %s752_s10 = smov %s541_s11 }
 0x103   : > { %s753_s11 = smov %s622_s21  ;;  %s754_s12 = smov %s549_s13 }
 0x104   : > { %s755_s13 = smov %s757_s16  ;;  %17 = sbr.rel (!%p15_p9) target bundleno = 6 (0x6), region = 89 }
 0x10b   :  { %277 = vsyncpa [#allocation4], 1 }
 0x10c   :  { %279 = vsyncpa [#allocation4 + $0x1], 1 }
 0x10d   :  { %280 = vsyncpa [#allocation6], 1 }
 0x10e   :  { %282 = vsyncpa [#allocation6 + $0x1], 1 }

</bundles_post_ra>
